<compile_context>
chip_gen: v7x
topology: tpu7x:2x2x1
jax: 0.10.0
libtpu: 0.0.40
codegen_flags: <defaults>
</compile_context>

<pallas_src>
import math

import jax
import jax.numpy as jnp
import numpy as np
from jax import lax
from jax.experimental import pallas as pl
from jax.experimental.pallas import tpu as pltpu


LANE = 128
SUBLANE_BF16 = 16


def _round_up(x, m):
    return ((x + m - 1) // m) * m


def _pad_to(x, shape):
    out = jnp.zeros(shape, x.dtype)
    return out.at[tuple(slice(0, s) for s in x.shape)].set(x)


def _vmem_limit_bytes():
    # Generation-aware VMEM budget: ~3/4 of physical, capped at 100 MiB.
    try:
        cap = pltpu.get_tpu_info().vmem_capacity_bytes
    except Exception:
        cap = 64 * 1024 * 1024  # conservative (v7x per-TC) fallback
    return int(min((cap * 3) // 4, 100 * 1024 * 1024))


# ----------------------------------------------------------------------------
# Fused kernel: bf16 adjacency fusion + all GCN layers + layer/node mean pool.
# ----------------------------------------------------------------------------
def _make_kernel(num_layers, n_valid, n_pad):
    inv = 1.0 / float(num_layers * n_valid)
    need_mask = n_pad != n_valid

    def kernel(wb_ref, a_ref, x_ref, w0_ref, wr_ref, b_ref, pooled_ref):
        # wb_ref:     SMEM (2,) f32            adjacency-channel fusion weights
        # a_ref:      VMEM (1, 2, N, N) bf16   both adjacency channels, batch b
        # x_ref:      VMEM (1, N, P_in) bf16   zero-padded node features
        # w0_ref:     VMEM (P_in, P_h) bf16    layer-0 GCN weight
        # wr_ref:     VMEM (Lr, P_h, P_h) bf16 stacked layer>=1 GCN weights
        # b_ref:      VMEM (L, 1, P_h) f32     stacked GCN biases
        # pooled_ref: VMEM (1, 1, P_h) f32     mean-over-layers/nodes embedding
        p_h = pooled_ref.shape[-1]

        # Weighted fusion of the two adjacency channels, entirely in bf16:
        # no (N, N) f32 temporary and no full-tile cast before the first
        # A @ support matmul.  final_A stays resident in VMEM for all layers.
        w0 = wb_ref[0].astype(jnp.bfloat16)
        w1 = wb_ref[1].astype(jnp.bfloat16)
        a_bf = w0 * a_ref[0, 0] + w1 * a_ref[0, 1]               # (N, N) bf16

        if need_mask:
            # Zero out zero-padded adjacency rows (they would otherwise pick
            # up the broadcast bias) before pooling / the next layer.
            row_mask = (lax.broadcasted_iota(jnp.int32, (n_pad, 1), 0)
                        < n_valid).astype(jnp.float32)

        x_bf = x_ref[0]                                          # (N, P_in)
        acc = jnp.zeros((1, p_h), jnp.float32)

        for l in range(num_layers):                              # unrolled
            w_bf = w0_ref[...] if l == 0 else wr_ref[l - 1]
            # support = X @ W   (bf16 MXU inputs, f32 accumulation)
            support = jnp.dot(x_bf, w_bf,
                              preferred_element_type=jnp.float32)
            # out = A @ support + b
            out = jnp.dot(a_bf, support.astype(jnp.bfloat16),
                          preferred_element_type=jnp.float32)
            # relu(dropout(gcn(x))) with dropout == identity (eval mode).
            x_f32 = jnp.maximum(out + b_ref[l], 0.0)
            if need_mask:
                x_f32 = x_f32 * row_mask
            # Fused layer-mean + node-mean pooling (f32 accumulation).
            acc = acc + jnp.sum(x_f32, axis=0, keepdims=True)
            x_bf = x_f32.astype(jnp.bfloat16)

        pooled_ref[0] = acc * inv

    return kernel


# ----------------------------------------------------------------------------
# Wrapper
# ----------------------------------------------------------------------------
def mhgcn_forward(A_batch, feature, params):
    B, C, N, _ = A_batch.shape
    assert C == 2
    gcn_layers = params["gcn_layers"]
    L = len(gcn_layers)
    nfeat = feature.shape[-1]
    nhid = gcn_layers[0][0].shape[1]

    # Independent lane padding for the input-feature and hidden dims.
    P_in = _round_up(max(nfeat, 1), LANE)
    P_h = _round_up(max(nhid, 1), LANE)
    N_pad = _round_up(N, SUBLANE_BF16)

    # bf16 adjacency / features: halves the dominant HBM DMA.  ReLU and the
    # zero padding keep padded lanes exactly zero through every layer.
    A_bf = A_batch.astype(jnp.bfloat16)
    if N_pad != N:
        A_bf = _pad_to(A_bf, (B, C, N_pad, N_pad))
    feat_bf = _pad_to(feature.astype(jnp.bfloat16), (B, N_pad, P_in))

    # Pre-cast / pre-pad weights once in the wrapper (free vs. the kernel).
    W0_p = _pad_to(gcn_layers[0][0].astype(jnp.bfloat16), (P_in, P_h))
    Lr = max(L - 1, 1)
    W_rest = jnp.zeros((Lr, P_h, P_h), jnp.bfloat16)
    for l in range(1, L):
        W_rest = W_rest.at[l - 1].set(
            _pad_to(gcn_layers[l][0].astype(jnp.bfloat16), (P_h, P_h)))
    b_stack = jnp.zeros((L, 1, P_h), jnp.float32)
    for l in range(L):
        b_stack = b_stack.at[l, 0, :nhid].set(gcn_layers[l][1])

    wb = params["weight_b"].astype(jnp.float32)

    vmem_limit = _vmem_limit_bytes()
    # Rough resident-VMEM estimate: double-buffered bf16 A and X blocks,
    # weight/bias blocks (x2 default buffering), fused-A value and f32 temps.
    est = (2 * C * N_pad * N_pad * 2
           + 2 * N_pad * P_in * 2
           + 2 * (P_in * P_h + Lr * P_h * P_h) * 2 + 2 * L * P_h * 4
           + 2 * N_pad * N_pad * 2
           + 4 * N_pad * max(P_in, P_h) * 4)
    if est > vmem_limit:
        # TODO(synk): switch to the row-tiled A @ support path instead of
        # failing once it is implemented.
        raise ValueError(
            f"MHGCN fused kernel needs ~{est / 2**20:.1f} MiB VMEM but only "
            f"{vmem_limit / 2**20:.1f} MiB is budgeted; graph too large for "
            f"the fully-resident design on this TPU generation.")

    kernel = _make_kernel(L, N, N_pad)

    pooled = pl.pallas_call(
        kernel,
        out_shape=jax.ShapeDtypeStruct((B, 1, P_h), jnp.float32),
        grid=(B,),
        in_specs=[
            pl.BlockSpec(memory_space=pltpu.MemorySpace.SMEM),          # wb
            pl.BlockSpec((1, C, N_pad, N_pad), lambda b: (b, 0, 0, 0)), # A
            pl.BlockSpec((1, N_pad, P_in), lambda b: (b, 0, 0)),        # feats
            pl.BlockSpec((P_in, P_h), lambda b: (0, 0)),                # W0
            pl.BlockSpec((Lr, P_h, P_h), lambda b: (0, 0, 0)),          # W1..L
            pl.BlockSpec((L, 1, P_h), lambda b: (0, 0, 0)),             # biases
        ],
        out_specs=pl.BlockSpec((1, 1, P_h), lambda b: (b, 0, 0)),
        compiler_params=pltpu.CompilerParams(
            dimension_semantics=("parallel",),
            vmem_limit_bytes=vmem_limit,
        ),
    )(wb, A_bf, feat_bf, W0_p, W_rest, b_stack)

    emb = pooled[:, 0, :nhid]                     # (B, nhid) pooled embedding
    # Tiny (B, H) @ (H, out) output projection stays in plain XLA (out is only
    # a few lanes wide; a Pallas kernel here would force masked partial stores).
    out = emb @ params["W_out"] + params["b_out"]
    # PyTorch: `embeds.squeeze()` result is discarded when out == 1; keep (B, out).
    return out


# ----------------------------------------------------------------------------
# Deterministic parameter construction (mirrors the PyTorch __init__ shapes)
# ----------------------------------------------------------------------------
def make_params(key, nfeat, nlayers, nhid, out):
    keys = jax.random.split(key, 2 * nlayers + 3)
    gcn_layers = []
    fin = nfeat
    for l in range(nlayers):
        stdv = 1.0 / math.sqrt(nhid)
        W = jax.random.uniform(keys[2 * l], (fin, nhid), jnp.float32, -stdv, stdv)
        b = jax.random.uniform(keys[2 * l + 1], (nhid,), jnp.float32, -stdv, stdv)
        gcn_layers.append((W, b))
        fin = nhid
    lim = 1.0 / math.sqrt(nhid)
    W_out = jax.random.uniform(keys[-3], (nhid, out), jnp.float32, -lim, lim)
    b_out = jax.random.uniform(keys[-2], (out,), jnp.float32, -lim, lim)
    weight_b = jax.random.uniform(keys[-1], (2,), jnp.float32, 0.0, 0.1)
    return {
        "gcn_layers": gcn_layers,
        "W_out": W_out,
        "b_out": b_out,
        "weight_b": weight_b,
    }


# ----------------------------------------------------------------------------
# References
# ----------------------------------------------------------------------------
def mhgcn_reference_f32(A_batch, feature, params):
    """Pure-f32 reference (exact PyTorch eval-mode semantics)."""
    w = params["weight_b"]
    final_A = w[0] * A_batch[:, 0] + w[1] * A_batch[:, 1]
    x = feature
    embeds = []
    for W, b in params["gcn_layers"]:
        x = jnp.maximum(jnp.einsum("bij,bjk->bik", final_A, x @ W) + b, 0.0)
        embeds.append(x)
    e = jnp.stack(embeds, axis=0).mean(0).mean(axis=1)
    return e @ params["W_out"] + params["b_out"]


def mhgcn_reference_bf16(A_batch, feature, params):
    """Reference using the same bf16 fusion / MXU-input casts as the kernel."""
    L = len(params["gcn_layers"])
    B, N = feature.shape[0], feature.shape[1]
    nhid = params["gcn_layers"][0][0].shape[1]
    w_bf = params["weight_b"].astype(jnp.bfloat16)
    A_bf = A_batch.astype(jnp.bfloat16)
    final_A = w_bf[0] * A_bf[:, 0] + w_bf[1] * A_bf[:, 1]       # bf16 fusion
    x = feature.astype(jnp.bfloat16)
    acc = jnp.zeros((B, nhid), jnp.float32)
    for W, b in params["gcn_layers"]:
        support = jnp.einsum("bnf,fh->bnh", x, W.astype(jnp.bfloat16),
                             preferred_element_type=jnp.float32)
        out = jnp.einsum("bij,bjh->bih", final_A, support.astype(jnp.bfloat16),
                         preferred_element_type=jnp.float32) + b
        xf = jnp.maximum(out, 0.0)
        acc = acc + jnp.sum(xf, axis=1)
        x = xf.astype(jnp.bfloat16)
    emb = acc * (1.0 / (L * N))
    return emb @ params["W_out"] + params["b_out"]


if __name__ == "__main__":
    B, C, N = 2, 2, 16
    nfeat, nlayers, nhid, out = 16, 2, 32, 4

    key = jax.random.PRNGKey(0)
    k_a, k_f, k_p = jax.random.split(key, 3)
    A_batch = jax.random.uniform(k_a, (B, C, N, N), jnp.float32)
    feature = jax.random.normal(k_f, (B, N, nfeat), jnp.float32)
    params = make_params(k_p, nfeat, nlayers, nhid, out)

    result = jax.block_until_ready(mhgcn_forward(A_batch, feature, params))

    ref_matched = mhgcn_reference_bf16(A_batch, feature, params)
    ref_f32 = mhgcn_reference_f32(A_batch, feature, params)
    # Check against a reference using the same bf16 casts / fusion order.
    np.testing.assert_allclose(np.asarray(result), np.asarray(ref_matched),
                               rtol=1e-2, atol=1e-2)
    # Loose check against the exact f32 PyTorch semantics (bf16 rounding only).
    np.testing.assert_allclose(np.asarray(result), np.asarray(ref_f32),
                               rtol=5e-2, atol=5e-2)

    print("KERNEL_OK")
</pallas_src>

<mosaic_0001>
module attributes {stable_mosaic.version = 11 : i64} {
  func.func @kernel(%arg0: i32, %arg1: memref<2xf32, #tpu.memory_space<smem>>, %arg2: memref<1x2x16x16xbf16, #tpu.memory_space<vmem>>, %arg3: memref<1x16x128xbf16, #tpu.memory_space<vmem>>, %arg4: memref<128x128xbf16, #tpu.memory_space<vmem>>, %arg5: memref<1x128x128xbf16, #tpu.memory_space<vmem>>, %arg6: memref<2x1x128xf32, #tpu.memory_space<vmem>>, %arg7: memref<1x1x128xf32, #tpu.memory_space<vmem>>) attributes {dimension_semantics = [#tpu.dimension_semantics<parallel>], iteration_bounds = array<i64: 2>, scalar_prefetch = 0 : i64, scratch_operands = 0 : i64, tpu.core_type = #tpu.core_type<tc>, window_params = [{transform_indices = @transform_0, window_bounds = array<i64: 2>}, {transform_indices = @transform_1, window_bounds = array<i64: 1, 2, 16, 16>}, {transform_indices = @transform_2, window_bounds = array<i64: 1, 16, 128>}, {pipeline_mode = #tpu.pipeline_mode<synchronous>, transform_indices = @transform_3, window_bounds = array<i64: 128, 128>}, {pipeline_mode = #tpu.pipeline_mode<synchronous>, transform_indices = @transform_4, window_bounds = array<i64: 1, 128, 128>}, {pipeline_mode = #tpu.pipeline_mode<synchronous>, transform_indices = @transform_5, window_bounds = array<i64: 2, 1, 128>}, {transform_indices = @transform_6, window_bounds = array<i64: 1, 1, 128>}]} {
    %c0 = arith.constant 0 : index
    %0 = memref.load %arg1[%c0] : memref<2xf32, #tpu.memory_space<smem>>
    %1 = arith.truncf %0 : f32 to bf16
    %c1 = arith.constant 1 : index
    %2 = memref.load %arg1[%c1] : memref<2xf32, #tpu.memory_space<smem>>
    %3 = arith.truncf %2 : f32 to bf16
    %c0_0 = arith.constant 0 : index
    %c0_1 = arith.constant 0 : index
    %c0_2 = arith.constant 0 : index
    %c0_3 = arith.constant 0 : index
    %4 = vector.load %arg2[%c0_0, %c0_1, %c0_2, %c0_3] : memref<1x2x16x16xbf16, #tpu.memory_space<vmem>>, vector<1x1x16x16xbf16>
    %5 = vector.shape_cast %4 : vector<1x1x16x16xbf16> to vector<16x16xbf16>
    %6 = vector.broadcast %1 : bf16 to vector<16x16xbf16>
    %7 = arith.mulf %6, %5 : vector<16x16xbf16>
    %c0_4 = arith.constant 0 : index
    %c1_5 = arith.constant 1 : index
    %c0_6 = arith.constant 0 : index
    %c0_7 = arith.constant 0 : index
    %8 = vector.load %arg2[%c0_4, %c1_5, %c0_6, %c0_7] : memref<1x2x16x16xbf16, #tpu.memory_space<vmem>>, vector<1x1x16x16xbf16>
    %9 = vector.shape_cast %8 : vector<1x1x16x16xbf16> to vector<16x16xbf16>
    %10 = vector.broadcast %3 : bf16 to vector<16x16xbf16>
    %11 = arith.mulf %10, %9 : vector<16x16xbf16>
    %12 = arith.addf %7, %11 : vector<16x16xbf16>
    %c0_8 = arith.constant 0 : index
    %c0_9 = arith.constant 0 : index
    %c0_10 = arith.constant 0 : index
    %13 = vector.load %arg3[%c0_8, %c0_9, %c0_10] : memref<1x16x128xbf16, #tpu.memory_space<vmem>>, vector<1x16x128xbf16>
    %14 = vector.shape_cast %13 : vector<1x16x128xbf16> to vector<16x128xbf16>
    %cst = arith.constant 0.000000e+00 : f32
    %15 = vector.broadcast %cst : f32 to vector<1x128xf32>
    %c0_11 = arith.constant 0 : index
    %c0_12 = arith.constant 0 : index
    %16 = vector.load %arg4[%c0_11, %c0_12] : memref<128x128xbf16, #tpu.memory_space<vmem>>, vector<128x128xbf16>
    %cst_13 = arith.constant dense<0.000000e+00> : vector<16x128xf32>
    %17 = tpu.matmul %14, %16, %cst_13 {dimension_numbers = #tpu.dot_dimension_numbers<[1], [0], [0], [1], [0, 0, 1, 1], [], []>} : vector<16x128xbf16>, vector<128x128xbf16>, vector<16x128xf32> -> vector<16x128xf32>
    %18 = arith.truncf %17 : vector<16x128xf32> to vector<16x128xbf16>
    %cst_14 = arith.constant dense<0.000000e+00> : vector<16x128xf32>
    %19 = tpu.matmul %12, %18, %cst_14 {dimension_numbers = #tpu.dot_dimension_numbers<[1], [0], [0], [1], [0, 0, 1, 1], [], []>} : vector<16x16xbf16>, vector<16x128xbf16>, vector<16x128xf32> -> vector<16x128xf32>
    %c0_15 = arith.constant 0 : index
    %c0_16 = arith.constant 0 : index
    %c0_17 = arith.constant 0 : index
    %20 = vector.load %arg6[%c0_15, %c0_16, %c0_17] : memref<2x1x128xf32, #tpu.memory_space<vmem>>, vector<1x1x128xf32>
    %21 = vector.shape_cast %20 : vector<1x1x128xf32> to vector<1x128xf32>
    %22 = vector.broadcast %21 : vector<1x128xf32> to vector<16x128xf32>
    %23 = arith.addf %19, %22 : vector<16x128xf32>
    %cst_18 = arith.constant 0.000000e+00 : f32
    %24 = vector.broadcast %cst_18 : f32 to vector<16x128xf32>
    %25 = arith.maximumf %23, %24 : vector<16x128xf32>
    %cst_19 = arith.constant dense<0.000000e+00> : vector<128xf32>
    %26 = vector.multi_reduction <add>, %25, %cst_19 [0] : vector<16x128xf32> to vector<128xf32>
    %27 = vector.shape_cast %26 : vector<128xf32> to vector<1x128xf32>
    %28 = arith.addf %15, %27 : vector<1x128xf32>
    %29 = arith.truncf %25 : vector<16x128xf32> to vector<16x128xbf16>
    %c0_20 = arith.constant 0 : index
    %c0_21 = arith.constant 0 : index
    %c0_22 = arith.constant 0 : index
    %30 = vector.load %arg5[%c0_20, %c0_21, %c0_22] : memref<1x128x128xbf16, #tpu.memory_space<vmem>>, vector<1x128x128xbf16>
    %31 = vector.shape_cast %30 : vector<1x128x128xbf16> to vector<128x128xbf16>
    %cst_23 = arith.constant dense<0.000000e+00> : vector<16x128xf32>
    %32 = tpu.matmul %29, %31, %cst_23 {dimension_numbers = #tpu.dot_dimension_numbers<[1], [0], [0], [1], [0, 0, 1, 1], [], []>} : vector<16x128xbf16>, vector<128x128xbf16>, vector<16x128xf32> -> vector<16x128xf32>
    %33 = arith.truncf %32 : vector<16x128xf32> to vector<16x128xbf16>
    %cst_24 = arith.constant dense<0.000000e+00> : vector<16x128xf32>
    %34 = tpu.matmul %12, %33, %cst_24 {dimension_numbers = #tpu.dot_dimension_numbers<[1], [0], [0], [1], [0, 0, 1, 1], [], []>} : vector<16x16xbf16>, vector<16x128xbf16>, vector<16x128xf32> -> vector<16x128xf32>
    %c1_25 = arith.constant 1 : index
    %c0_26 = arith.constant 0 : index
    %c0_27 = arith.constant 0 : index
    %35 = vector.load %arg6[%c1_25, %c0_26, %c0_27] : memref<2x1x128xf32, #tpu.memory_space<vmem>>, vector<1x1x128xf32>
    %36 = vector.shape_cast %35 : vector<1x1x128xf32> to vector<1x128xf32>
    %37 = vector.broadcast %36 : vector<1x128xf32> to vector<16x128xf32>
    %38 = arith.addf %34, %37 : vector<16x128xf32>
    %cst_28 = arith.constant 0.000000e+00 : f32
    %39 = vector.broadcast %cst_28 : f32 to vector<16x128xf32>
    %40 = arith.maximumf %38, %39 : vector<16x128xf32>
    %cst_29 = arith.constant dense<0.000000e+00> : vector<128xf32>
    %41 = vector.multi_reduction <add>, %40, %cst_29 [0] : vector<16x128xf32> to vector<128xf32>
    %42 = vector.shape_cast %41 : vector<128xf32> to vector<1x128xf32>
    %43 = arith.addf %28, %42 : vector<1x128xf32>
    %cst_30 = arith.constant 3.125000e-02 : f32
    %44 = vector.broadcast %cst_30 : f32 to vector<1x128xf32>
    %45 = arith.mulf %43, %44 : vector<1x128xf32>
    %c0_31 = arith.constant 0 : index
    %c0_32 = arith.constant 0 : index
    %c0_33 = arith.constant 0 : index
    %46 = vector.load %arg7[%c0_31, %c0_32, %c0_33] : memref<1x1x128xf32, #tpu.memory_space<vmem>>, vector<1x1x128xf32>
    %47 = vector.shape_cast %46 : vector<1x1x128xf32> to vector<1x128xf32>
    %48 = vector.shape_cast %45 : vector<1x128xf32> to vector<1x1x128xf32>
    tpu.vector_store %arg7[%c0_31, %c0_32, %c0_33], %48 {strides = array<i32>} : memref<1x1x128xf32, #tpu.memory_space<vmem>>, vector<1x1x128xf32>,
    return
  }
  func.func @transform_0(%arg0: i32) -> i32 {
    %c0_i32 = arith.constant 0 : i32
    %c0_i32_0 = arith.constant 0 : i32
    return %c0_i32 : i32
  }
  func.func @transform_1(%arg0: i32) -> (i32, i32, i32, i32) {
    %c0_i32 = arith.constant 0 : i32
    %c0_i32_0 = arith.constant 0 : i32
    %c0_i32_1 = arith.constant 0 : i32
    %c0_i32_2 = arith.constant 0 : i32
    return %arg0, %c0_i32, %c0_i32_0, %c0_i32_1 : i32, i32, i32, i32
  }
  func.func @transform_2(%arg0: i32) -> (i32, i32, i32) {
    %c0_i32 = arith.constant 0 : i32
    %c0_i32_0 = arith.constant 0 : i32
    %c0_i32_1 = arith.constant 0 : i32
    return %arg0, %c0_i32, %c0_i32_0 : i32, i32, i32
  }
  func.func @transform_3(%arg0: i32) -> (i32, i32) {
    %c0_i32 = arith.constant 0 : i32
    %c0_i32_0 = arith.constant 0 : i32
    %c0_i32_1 = arith.constant 0 : i32
    return %c0_i32, %c0_i32_0 : i32, i32
  }
  func.func @transform_4(%arg0: i32) -> (i32, i32, i32) {
    %c0_i32 = arith.constant 0 : i32
    %c0_i32_0 = arith.constant 0 : i32
    %c0_i32_1 = arith.constant 0 : i32
    %c0_i32_2 = arith.constant 0 : i32
    return %c0_i32, %c0_i32_0, %c0_i32_1 : i32, i32, i32
  }
  func.func @transform_5(%arg0: i32) -> (i32, i32, i32) {
    %c0_i32 = arith.constant 0 : i32
    %c0_i32_0 = arith.constant 0 : i32
    %c0_i32_1 = arith.constant 0 : i32
    %c0_i32_2 = arith.constant 0 : i32
    return %c0_i32, %c0_i32_0, %c0_i32_1 : i32, i32, i32
  }
  func.func @transform_6(%arg0: i32) -> (i32, i32, i32) {
    %c0_i32 = arith.constant 0 : i32
    %c0_i32_0 = arith.constant 0 : i32
    %c0_i32_1 = arith.constant 0 : i32
    return %arg0, %c0_i32, %c0_i32_0 : i32, i32, i32
  }
}

</mosaic_0001>

<bundles_post_ra>
// kernel: tpu_custom_call.1
= control target key start
LH: loop header
LB: loop body
LE: loop exit
PB: predicated region body
PF: predicated region fallthrough
CT: control target
= control target key end

     0   :  { %s1717_s0 = inlined_call_operand.hbm [shape: f32[2], index: 0, kind: input, shape index: {}]   ;;  %s1718_s1 = inlined_call_operand.hbm [shape: bf16[2,2,16,16], index: 1, kind: input, shape index: {}]   ;;  %s1719_s2 = inlined_call_operand.hbm [shape: bf16[2,16,128], index: 2, kind: input, shape index: {}]   ;;  %s1720_s3 = inlined_call_operand.hbm [shape: bf16[128,128], index: 3, kind: input, shape index: {}]   ;;  %s1721_s4 = inlined_call_operand.hbm [shape: bf16[1,128,128], index: 4, kind: input, shape index: {}]   ;;  %s1722_s5 = inlined_call_operand.vmem [shape: f32[2,1,128], index: 5, kind: input, shape index: {}]   ;;  %s1723_s6 = inlined_call_operand.hbm [shape: f32[2,1,128], index: 6, kind: output, shape index: {}]  }
   0x1   :  { %1729 = sst [smem:[#allocation19_spill]] %s1717_s0 }
   0x2   :  { %1730 = sst [smem:[#allocation20_spill]] %s1718_s1 }
   0x3   :  { %1731 = sst [smem:[#allocation21_spill]] %s1720_s3 }
   0x4   :  { %1732 = sst [smem:[#allocation22_spill]] %s1721_s4 }
   0x5   :  { %11 = vsyncpa [#allocation5], 0 }
   0x6   :  { %12 = vsyncpa [#allocation3], 0 }
   0x7   :  { %14 = vsyncpa [#allocation3 + $0x1], 0 }
   0x8   :  { %15 = vsyncpa [#allocation8], 0 }
   0x9   :  { %17 = vsyncpa [#allocation8 + $0x1], 0 }
   0xa   :  { %18 = vsyncpa [#allocation11], 0 }
   0xb   :  { %19 = vsyncpa [#allocation4], 0 }
   0xc   :  { %21 = vsyncpa [#allocation4 + $0x1], 0  ;;  %s1358_s21 = smov 0   ;;  %s1360_s22 = smov 0  }
   0xd   :  { %s1362_s23 = smov 0   ;;  %s1364_s24 = smov 0  }
   0xe LB: > { %s1379_s25 = sadd.s32 4294967295, %s1311_s24   ;;  %s874_s26 = sadd.s32 4294967294, %s1311_s24   ;;  %s1311_s24 = sphi %s1364_s24, %s1760_s24   ;;  %s1307_s23 = sphi %s1362_s23, %s1759_s23   ;;  %s1303_s22 = sphi %s1360_s22, %s1758_s22   ;;  %s1299_s21 = sphi %s1358_s21, %s1757_s21  }
   0xf   : > { %p68_p0 = scmp.ne.s32.totalorder %s1303_s22, %s1299_s21  ;;  %p1724_p1 = scmp.eq.s32.totalorder %s1379_s25, 0 }
  0x10   : > { %p187_p3 = scmp.eq.s32.totalorder %s874_s26, 1  ;;  %p875_p5 = scmp.ge.s32.totalorder %s1311_s24, 1 }
  0x11   : > { %p1388_p4 = por %p1724_p1, %p68_p0  ;;  %p194_p7 = scmp.lt.s32.totalorder %s1311_s24, 3 }
  0x12   : > { %p1393_p6 = por %p187_p3, %p68_p0  ;;  %s1313_s30 = smov [#allocation9]  }
  0x13   : > { %s1733_s27 = scalar_select %p1388_p4, 1, 0 }
  0x14   : > { %s1734_s28 = scalar_select %p1393_p6, 1, 0 }
  0x15   : > { %p1398_p8 = pnand %p875_p5, %p194_p7  ;;  %s215_s7 = sshll.u32 %s1313_s30, 4  ;;  %s1402_s7 = int_to_ptr.vmem [resolvable:$true] %s215_s7 }
  0x16   : > { %s1314_s9 = smov [#allocation10]   ;;  %s1737_s3 = sld [smem:[#allocation21_spill]] }
  0x17   : > { %p1015_p9 = pneg %p1398_p8  ;;  %s228_s10 = sshll.u32 %s1314_s9, 4  ;;  %s1413_s10 = int_to_ptr.vmem [resolvable:$true] %s228_s10 }
  0x19   : > { %p1409_p11 = pnand %p1015_p9, %p1724_p1 }
  0x1b   : > { %p1423_p13 = pneg %p1409_p11 }
  0x1c   : > { %s1100_s13 = scalar_lea.hbm %s1737_s3, 1024 }
  0x1d   : > { %p1101_p12 = scmp.ne.s32.totalorder %s1737_s3, %s1100_s13  ;;  %p1107_p5 = scmp.lt.u32.totalorder %s1100_s13, %s1737_s3 }
  0x1f   : > { %p1103_p0 = pnand %p1423_p13, %p1101_p12 }
  0x21   : > { %p1104_p3 = pneg %p1103_p0 }
  0x23   : > { %p1109_p7 = pnand %p1107_p5, %p1104_p3 }
  0x25   : > { %1112 = shalt.err (!%p1109_p7)
}
  0x26   : > { %s1113_s19 = scalar_lea.vmem %s1402_s7, 1024  ;;  %p1121_p2 = scmp.lt.s32.totalorder %s1402_s7, %s1402_s7 }
  0x27   : > { %p1114_p9 = scmp.ne.s32.totalorder %s1402_s7, %s1113_s19  ;;  %p1122_p6 = scmp.lt.s32.totalorder %s1113_s19, %s1113_s19 }
  0x29   : > { %p1116_p10 = pnand %p1114_p9, %p1423_p13  ;;  %p1123_p12 = por %p1122_p6, %p1121_p2 }
  0x2b   : > { %p1117_p1 = pneg %p1116_p10 }
  0x2d   : > { %p1124_p0 = pnand %p1123_p12, %p1117_p1 }
  0x2f   : > { %1127 = shalt.err (!%p1124_p0)
}
  0x30   : > { %s1725_s20 = smov 64   ;;  %s1316_s26 = smov 4  }
  0x31   : > { %1021 = dma.hbm_to_vmem [thread:$0]  (!%p1409_p11), %s1737_s3, 1024, %s1402_s7, [#allocation8], %s1725_s20, %s1725_s20, %s1316_s26  }
  0x32   : > { %s1739_s0 = sld [smem:[#allocation19_spill]] }
  0x38   : > { %s1128_s13 = scalar_lea.hbm %s1739_s0, 16 }
  0x39   : > { %p1129_p1 = scmp.ne.s32.totalorder %s1739_s0, %s1128_s13  ;;  %p1135_p10 = scmp.lt.u32.totalorder %s1128_s13, %s1739_s0 }
  0x3b   : > { %p1131_p2 = pnand %p1129_p1, %p1423_p13 }
  0x3d   : > { %p1132_p6 = pneg %p1131_p2 }
  0x3f   : > { %p1137_p3 = pnand %p1135_p10, %p1132_p6 }
  0x41   : > { %1140 = shalt.err (!%p1137_p3)
}
  0x42   : > { %s1317_s19 = smov [#allocation2]   ;;  %s1740_s4 = sld [smem:[#allocation22_spill]] }
  0x43   : > { %1018 = dma.hbm_to_smem (!%p1409_p11), %s1739_s0, 16, %s1317_s19, [#allocation5]  }
  0x48   : > { %s1141_s12 = scalar_lea.hbm %s1740_s4, 1024 }
  0x49   : > { %p1142_p5 = scmp.ne.s32.totalorder %s1740_s4, %s1141_s12  ;;  %p1148_p12 = scmp.lt.u32.totalorder %s1141_s12, %s1740_s4 }
  0x4b   : > { %p1144_p7 = pnand %p1142_p5, %p1423_p13 }
  0x4d   : > { %p1145_p9 = pneg %p1144_p7 }
  0x4f   : > { %p1150_p0 = pnand %p1148_p12, %p1145_p9 }
  0x51   : > { %1153 = shalt.err (!%p1150_p0)
}
  0x52   : > { %s1154_s18 = scalar_lea.vmem %s1413_s10, 1024  ;;  %p1162_p10 = scmp.lt.s32.totalorder %s1413_s10, %s1413_s10 }
  0x53   : > { %p1155_p1 = scmp.ne.s32.totalorder %s1413_s10, %s1154_s18  ;;  %p1163_p3 = scmp.lt.s32.totalorder %s1154_s18, %s1154_s18 }
  0x55   : > { %p1157_p2 = pnand %p1155_p1, %p1423_p13  ;;  %p1164_p5 = por %p1163_p3, %p1162_p10 }
  0x57   : > { %p1158_p6 = pneg %p1157_p2 }
  0x59   : > { %p1165_p7 = pnand %p1164_p5, %p1158_p6 }
  0x5b   : > { %1168 = shalt.err (!%p1165_p7)
}
  0x5c   : > { %1024 = dma.hbm_to_vmem [thread:$0]  (!%p1409_p11), %s1740_s4, 1024, %s1413_s10, [#allocation11], %s1725_s20, %s1725_s20, %s1316_s26  }
  0x5d   : > { %s1490_s8 = sadd.s32 1, %s1311_s24   ;;  %s55_s30 = sadd.s32 1, %s1307_s23 }
  0x5e   : > { %s52_s16 = ssub.s32 %s1311_s24, %s1490_s8  ;;  %p62_p9 = scmp.ne.s32.totalorder %s1307_s23, %s1303_s22 }
  0x5f   : > { %p53_p13 = scmp.eq.s32.totalorder %s52_s16, 0  ;;  %p63_p12 = scmp.eq.s32.totalorder %s1311_s24, 0 }
  0x60   : > { %p1039_p0 = scmp.lt.s32.totalorder %s1311_s24, 2  ;;  %p1741_p2 = scmp.eq.s32.totalorder %s1379_s25, 1 }
  0x61   : > { %s1500_s9 = scalar_select %p53_p13, %s1307_s23, %s55_s30  }
  0x62   : > { %p64_p1 = por %p63_p12, %p62_p9  ;;  %p1504_p6 = por %p1741_p2, %p62_p9 }
  0x63   : > { %s1509_s12 = sand.u32 1, %s1307_s23   ;;  %s921_s10 = sshll.u32 %s1311_s24, 8 }
  0x64   : > { %s1742_s11 = scalar_select %p1504_p6, 1, 0 }
  0x65   : > { %s880_s14 = sshll.u32 %s1509_s12, 4  ;;  %s1743_s1 = sld [smem:[#allocation20_spill]] }
  0x66   : > { %s249_s18 = scalar_lea.vmem [#allocation6], %s880_s14  ;;  %p1518_p11 = pnand %p1039_p0, %p64_p1 }
  0x67   : > { %s256_s19 = sshll.u32 %s249_s18, 4  ;;  %s246_s30 = scalar_lea.sflag [#allocation3], %s1509_s12  ;;  %s1522_s19 = int_to_ptr.vmem [resolvable:$true] %s256_s19 }
  0x68   : > { %p1171_p3 = pneg %p1518_p11 }
  0x6b   : > { %s1516_s17 = scalar_lea.hbm %s1743_s1, %s921_s10  ;;  %s1174_s15 = scalar_lea.hbm %s1743_s1, 512 }
  0x6c   : > { %s1169_s20 = scalar_lea.hbm %s1516_s17, 256  ;;  %p1175_p13 = scmp.lt.u32.totalorder %s1516_s17, %s1743_s1 }
  0x6d   : > { %p1170_p10 = scmp.ne.s32.totalorder %s1516_s17, %s1169_s20  ;;  %p1176_p9 = scmp.lt.u32.totalorder %s1174_s15, %s1169_s20 }
  0x6e   : > { %p1178_p0 = scmp.lt.u32.totalorder %s1169_s20, %s1516_s17 }
  0x6f   : > { %p1172_p5 = pnand %p1171_p3, %p1170_p10  ;;  %p1177_p12 = por %p1176_p9, %p1175_p13 }
  0x71   : > { %p1173_p7 = pneg %p1172_p5  ;;  %p1179_p1 = por %p1178_p0, %p1177_p12 }
  0x73   : > { %p1180_p2 = pnand %p1179_p1, %p1173_p7 }
  0x75   : > { %1183 = shalt.err (!%p1180_p2)
}
  0x76   : > { %s1184_s16 = scalar_lea.vmem %s1522_s19, 256  ;;  %s1318_s10 = smov [#allocation6]  }
  0x77   : > { %p1185_p10 = scmp.ne.s32.totalorder %s1522_s19, %s1184_s16  ;;  %s1189_s14 = sshll.u32 %s1318_s10, 4  ;;  %s1190_s14 = int_to_ptr.vmem [resolvable:$false] %s1189_s14 }
  0x78   : > { %s1191_s13 = scalar_lea.vmem %s1190_s14, 512  ;;  %p1192_p4 = scmp.lt.s32.totalorder %s1522_s19, %s1190_s14 }
  0x79   : > { %p1187_p5 = pnand %p1185_p10, %p1171_p3  ;;  %p1193_p13 = scmp.lt.s32.totalorder %s1191_s13, %s1184_s16 }
  0x7b   : > { %p1188_p6 = pneg %p1187_p5  ;;  %p1194_p9 = por %p1193_p13, %p1192_p4 }
  0x7d   : > { %p1195_p12 = pnand %p1194_p9, %p1188_p6 }
  0x7f   : > { %1198 = shalt.err (!%p1195_p12)
}
  0x80   : > { %s1745_s20 = smov 64   ;;  %s883_s15 = sshll.u32 %s1509_s12, 3 }
  0x81   : > { %1028 = dma.hbm_to_vmem [thread:$0]  (!%p1518_p11), %s1516_s17, 256, %s1522_s19, %s246_s30, %s1745_s20, %s1745_s20, %s1316_s26  }
  0x82   : > { %s922_s18 = sshll.u32 %s1311_s24, 7  ;;  %s270_s13 = scalar_lea.vmem [#allocation7], %s883_s15 }
  0x83   : > { %s1561_s14 = scalar_lea.hbm %s1719_s2, %s922_s18  ;;  %s277_s0 = sshll.u32 %s270_s13, 4  ;;  %s1563_s0 = int_to_ptr.vmem [resolvable:$true] %s277_s0 }
  0x84   : > { %s1746_s1 = sand.u32 1, %s1311_s24   ;;  %s1199_s4 = scalar_lea.hbm %s1561_s14, 128 }
  0x85   : > { %s1567_s3 = scalar_lea.sflag [#allocation8], %s1746_s1  ;;  %p1200_p4 = scmp.ne.s32.totalorder %s1561_s14, %s1199_s4 }
  0x86   : > { %s1204_s19 = scalar_lea.hbm %s1719_s2, 256  ;;  %p1205_p0 = scmp.lt.u32.totalorder %s1561_s14, %s1719_s2 }
  0x87   : > { %p1202_p6 = pnand %p1200_p4, %p1171_p3  ;;  %p1206_p1 = scmp.lt.u32.totalorder %s1204_s19, %s1199_s4 }
  0x88   : > { %p1208_p10 = scmp.lt.u32.totalorder %s1199_s4, %s1561_s14 }
  0x89   : > { %p1203_p7 = pneg %p1202_p6  ;;  %p1207_p2 = por %p1206_p1, %p1205_p0 }
  0x8b   : > { %p1209_p5 = por %p1208_p10, %p1207_p2 }
  0x8d   : > { %p1210_p13 = pnand %p1209_p5, %p1203_p7 }
  0x8f   : > { %1213 = shalt.err (!%p1210_p13)
}
  0x90   : > { %s1214_s1 = scalar_lea.vmem %s1563_s0, 128  ;;  %s1319_s15 = smov [#allocation7]  }
  0x91   : > { %p1215_p9 = scmp.ne.s32.totalorder %s1563_s0, %s1214_s1  ;;  %s1219_s16 = sshll.u32 %s1319_s15, 4  ;;  %s1220_s16 = int_to_ptr.vmem [resolvable:$false] %s1219_s16 }
  0x92   : > { %s1221_s10 = scalar_lea.vmem %s1220_s16, 256  ;;  %p1222_p6 = scmp.lt.s32.totalorder %s1563_s0, %s1220_s16 }
  0x93   : > { %p1217_p12 = pnand %p1215_p9, %p1171_p3  ;;  %p1223_p0 = scmp.lt.s32.totalorder %s1221_s10, %s1214_s1 }
  0x95   : > { %p1218_p4 = pneg %p1217_p12  ;;  %p1224_p1 = por %p1223_p0, %p1222_p6 }
  0x97   : > { %p1225_p2 = pnand %p1224_p1, %p1218_p4 }
  0x99   : > { %1228 = shalt.err (!%p1225_p2)
}
  0x9a   : > { %1031 = dma.hbm_to_vmem [thread:$0]  (!%p1518_p11), %s1561_s14, 128, %s1563_s0, %s1567_s3, %s1745_s20, %s1745_s20, %s1316_s26  }
  0x9b   : > { %289 = sbr.rel (%p1398_p8) target bundleno = 1119 (0x45f), region = 44  ;;  %p1747_p3 = scmp.eq.s32.totalorder (!%p1398_p8), %s1379_s25, 0 }
  0xa2   : > { %1274 = dma.done.wait (%p1747_p3), [#allocation5], 16   ;;  %p1748_p7 = pmov %p1747_p3 }
  0xa3   : > { %s1603_s4 = sand.u32 1, %s1303_s22   ;;  %p1749_p11 = scmp.ne.s32.totalorder %s1733_s27, 0 }
  0xa4   : > { %1276 = vsyncadd (%p1748_p7), [#allocation5], 4294967280  ;;  %s888_s7 = sshll.u32 %s1603_s4, 4  ;;  %s296_s13 = scalar_lea.sflag [#allocation3], %s1603_s4 }
  0xa5   : > { %s1607_s12 = scalar_lea.vmem [#allocation6], %s888_s7 }
  0xa6   : > { %1278 = dma.done.wait (%p1749_p11), %s296_s13, 256  }
  0xa7   : > { %1280 = vsyncadd (%p1749_p11), %s296_s13, 4294967040  ;;  %s304_s0 = sand.u32 1, %s1379_s25   ;;  %s889_s3 = sshll.u32 %s1603_s4, 3 }
  0xa8   : > { %s305_s29 = scalar_lea.sflag [#allocation8], %s304_s0  ;;  %s1615_s26 = scalar_lea.vmem [#allocation7], %s889_s3 }
  0xa9   : > { %1282 = dma.done.wait (%p1749_p11), %s305_s29, 128  }
  0xaa   : > { %1284 = vsyncadd (%p1749_p11), %s305_s29, 4294967168  ;;  %p1750_p8 = pmov %p1747_p3 }
  0xab   : > { %p1751_p10 = pmov %p1747_p3 }
  0xac   : > { %1286 = dma.done.wait (%p1750_p8), [#allocation8], 1024  }
  0xad   : > { %1288 = vsyncadd (%p1751_p10), [#allocation8], 4294966272  ;;  %p1752_p5 = pmov %p1747_p3 }
  0xae   : > { %p1753_p13 = pmov %p1747_p3 }
  0xaf   : > { %1290 = dma.done.wait (%p1752_p5), [#allocation11], 1024  }
  0xb0   : > { %1292 = vsyncadd (%p1753_p13), [#allocation11], 4294966272 }
  0xb1   : > { %321 = sfence }
  0xb2   : > { %v1083_v0 = vld [vmem:[#allocation9] sm:$0xff]   ;;  %v1320_v1 = vmov 0.0   ;;  %v1084_v2 = vld [vmem:[#allocation9 + $0x8] sm:$0xff]   ;;  %vm1321_vm0 = vmmov 0   ;;  %v1085_v3 = vld [vmem:[#allocation9 + $0x10] sm:$0xff]   ;;  %s351_s27 = sld [smem:[#allocation2]] }
  0xb3   : > { %945 = vmatprep.subr.bf16.mxu0 %v1320_v1  ;;  %965 = vmatprep.subr.bf16.mxu1 %v1320_v1  ;;  %v1086_v4 = vld [vmem:[#allocation9 + $0x18] sm:$0xff]   ;;  %v1087_v5 = vld [vmem:[#allocation9 + $0x20] sm:$0xff]   ;;  %v1088_v6 = vld [vmem:[#allocation9 + $0x28] sm:$0xff]   ;;  %s892_s20 = sld [smem:[#allocation2 + $0x1]]  ;;  %vm518_vm1 = vcmask 130048   ;;  %p1754_p6 = scmp.ne.s32.totalorder %s1742_s11, 0 }
  0xb4   : > { %946 = vmatpush3.bf16.msra.mxu0 %v1083_v0  ;;  %961 = vmatprep.mubr.msk.bf16.mxu0 %vm1321_vm0, %v1320_v1  ;;  %v1089_v7 = vld [vmem:[#allocation9 + $0x30] sm:$0xff]   ;;  %v1090_v8 = vld [vmem:[#allocation9 + $0x38] sm:$0xff]   ;;  %v1092_v28 = vld [vmem:[#allocation10] sm:$0xff]  }
  0xb5   : > { %947 = vmatprep.subr.bf16.mxu0 %v1320_v1  ;;  %967 = vmatprep.mubr.msk.bf16.mxu1 %vm1321_vm0, %v1320_v1  ;;  %v1091_v9 = vld [vmem:[%s1615_s26] sm:$0xff]   ;;  %v893_v13 = vld [vmem:[%s1607_s12 + $0x8] sm:$0xf]  ;;  %v894_v14 = vld [vmem:[%s1607_s12 + $0xc] sm:$0xf] }
  0xb6   : > { %v373_v10 = vld [vmem:[%s1607_s12] sm:$0xf]  ;;  %v374_v11 = vld [vmem:[%s1607_s12 + $0x4] sm:$0xf]  ;;  %v1093_v29 = vld [vmem:[#allocation10 + $0x8] sm:$0xff]  }
  0xb7   : > { %v1094_v30 = vld [vmem:[#allocation10 + $0x10] sm:$0xff]   ;;  %v1095_v31 = vld [vmem:[#allocation10 + $0x18] sm:$0xff]   ;;  %v1096_v32 = vld [vmem:[#allocation10 + $0x20] sm:$0xff]  }
  0xb8   : > { %948 = vmatpush3.bf16.msra.mxu0 %v1084_v2  ;;  %s354_s14 = sshrl.u32 %s351_s27, 16  ;;  %p353_p9 = scmp.ne.f32.partialorder %s351_s27, %s351_s27  ;;  %v1097_v33 = vld [vmem:[#allocation10 + $0x28] sm:$0xff]   ;;  %v1098_v34 = vld [vmem:[#allocation10 + $0x30] sm:$0xff]   ;;  %v1099_v35 = vld [vmem:[#allocation10 + $0x38] sm:$0xff]  }
  0xb9   : > { %949 = vmatprep.subr.bf16.mxu0 %v1320_v1  ;;  %s365_s17 = sshrl.u32 %s892_s20, 16  ;;  %s355_s19 = sand.u32 1, %s354_s14  ;;  %v904_v36 = vld [vmem:[%s1722_s5] ss:$0 sm:$0xff]  ;;  %v916_v52 = vld [vmem:[%s1722_s5 + $0x1] ss:$0 sm:$0xff] }
  0xba   : > { %s366_s30 = sand.u32 1, %s365_s17  ;;  %s356_s18 = sadd.s32 32767, %s355_s19 }
  0xbb   : > { %s367_s1 = sadd.s32 32767, %s366_s30  ;;  %s357_s15 = sadd.s32 %s356_s18, %s351_s27 }
  0xbc   : > { %950 = vmatpush3.bf16.msra.mxu0 %v1085_v3  ;;  %s368_s16 = sadd.s32 %s892_s20, %s367_s1  ;;  %s358_s10 = sand.u32 4294901760, %s357_s15 }
  0xbd   : > { %951 = vmatprep.subr.bf16.mxu0 %v1320_v1  ;;  %p364_p12 = scmp.ne.f32.partialorder %s892_s20, %s892_s20  ;;  %s369_s7 = sand.u32 4294901760, %s368_s16 }
  0xbe   : > { %s1762_s10 = smov (%p353_p9, %s358_s10), 2143289344  ;;  %s918_s19 = sshll.u32 %s1379_s25, 4 }
  0xbf   : > { %s1764_s7 = smov (%p364_p12, %s369_s7), 2143289344  ;;  %s361_s13 = sshrl.u32 %s1762_s10, 16 }
  0xc0   : > { %952 = vmatpush3.bf16.msra.mxu0 %v1086_v4  ;;  %s372_s0 = sshrl.u32 %s1764_s7, 16  ;;  %s375_s3 = sshll.u32 %s361_s13, 16 }
  0xc1   : > { %953 = vmatprep.subr.bf16.mxu0 %v1320_v1  ;;  %s384_s29 = sshll.u32 %s372_s0, 16  ;;  %s376_s26 = sor.u32 %s375_s3, %s361_s13 }
  0xc2   : > { %s385_s14 = sor.u32 %s384_s29, %s372_s0  ;;  %v377_v12 = vstv %s376_s26  ;;  %s349_s30 = scalar_lea.vmem [#allocation12], %s1603_s4 }
  0xc3   : > { %v386_v15 = vstv %s385_s14  ;;  %v379_v16 = vmul.bf16 %v377_v12, %v373_v10  ;;  %v380_v17 = vmul.bf16 %v377_v12, %v374_v11  ;;  %s754_s18 = sshll.u32 %s349_s30, 4  ;;  %s1673_s16 = scalar_lea.hbm %s1723_s6, %s918_s19  ;;  %s1675_s18 = int_to_ptr.vmem [resolvable:$true] %s754_s18 }
  0xc4   : > { %954 = vmatpush3.bf16.msra.mxu0 %v1087_v5  ;;  %v388_v18 = vmul.bf16 %v893_v13, %v386_v15  ;;  %v389_v19 = vmul.bf16 %v894_v14, %v386_v15  ;;  %s742_s10 = scalar_lea.sflag [#allocation4], %s1603_s4  ;;  %s1229_s7 = scalar_lea.vmem %s1675_s18, 16 }
  0xc5   : > { %955 = vmatprep.subr.bf16.mxu0 %v1320_v1  ;;  %p1230_p4 = scmp.ne.s32.totalorder %s1675_s18, %s1229_s7  ;;  %s1322_s25 = smov [#allocation12]  }
  0xc6   : > { %v390_v21 = vadd.bf16 %v388_v18, %v379_v16  ;;  %v391_v22 = vadd.bf16 %v389_v19, %v380_v17  ;;  %s1233_s13 = sshll.u32 %s1322_s25, 4  ;;  %s1234_s13 = int_to_ptr.vmem [resolvable:$false] %s1233_s13 }
  0xc7   : > { %p1231_p0 = pnand %p1230_p4, %p1754_p6  ;;  %s1235_s0 = scalar_lea.vmem %s1234_s13, 32 }
  0xc8   : > { %956 = vmatpush3.bf16.msra.mxu0 %v1088_v6  ;;  %v905_v27 = vcombine.low %v390_v21, %v391_v22  ;;  %p1236_p2 = scmp.lt.s32.totalorder %s1675_s18, %s1234_s13  ;;  %p1237_p3 = scmp.lt.s32.totalorder %s1235_s0, %s1229_s7 }
  0xc9   : > { %957 = vmatprep.subr.bf16.mxu0 %v1320_v1  ;;  %p1232_p1 = pneg %p1231_p0 }
  0xca   : > { %p1238_p7 = por %p1237_p3, %p1236_p2 }
  0xcc   : > { %958 = vmatpush3.bf16.msra.mxu0 %v1089_v7  ;;  %p1239_p11 = pnand %p1238_p7, %p1232_p1 }
  0xcd   : > { %959 = vmatprep.subr.bf16.mxu0 %v1320_v1 }
  0xd0   : > { %960 = vmatpush3.bf16.msra.mxu0 %v1090_v8 }
  0xd1   : > { %991 = vmatprep.subr.bf16.mxu0 %v1320_v1 }
  0xd3   : > { %962 = vmatmul.mubr.bf16.vlgmr.msra.gmra.mrb[0].mxu0 %v1091_v9 }
  0xd4   : > { %993 = vmatprep.mubr.msk.bf16.mxu0 %vm1321_vm0, %v1320_v1 }
 0x1a6   : > { %v498_v20 = vpop.f32.mrb[0].mxu0 }
 0x1a7   : > { %v963_v23 = vpop.f32.mrb[1].mxu0 }
 0x1a8   : > { %v501_v24 = vpop.f32.mrb[2].mxu0 }
 0x1a9   : > { %v505_v25 = vpack.c.bf16 %v501_v24, %v498_v20  ;;  %v964_v26 = vpop.f32.mrb[3].mxu0 }
 0x1ab   : > { %966 = vmatpush3.bf16.msra.mxu1 %v505_v25 }
 0x1ac   : > { %971 = vmatprep.subr.bf16.mxu1 %v1320_v1 }
 0x1ae   : > { %968 = vmatmul.mubr.msk.bf16.vlgmr.msra.gmra.mrb[0].mxu1 %vm518_vm1, %v905_v27 }
 0x1af   : > { %972 = vmatpush3.bf16.msra.mxu1 %v1092_v28  ;;  %987 = vmatprep.mubr.msk.bf16.mxu1 %vm1321_vm0, %v1320_v1 }
 0x1b0   : > { %973 = vmatprep.subr.bf16.mxu1 %v1320_v1 }
 0x1b3   : > { %974 = vmatpush3.bf16.msra.mxu1 %v1093_v29 }
 0x1b4   : > { %975 = vmatprep.subr.bf16.mxu1 %v1320_v1 }
 0x1b7   : > { %976 = vmatpush3.bf16.msra.mxu1 %v1094_v30 }
 0x1b8   : > { %977 = vmatprep.subr.bf16.mxu1 %v1320_v1 }
 0x1bb   : > { %978 = vmatpush3.bf16.msra.mxu1 %v1095_v31 }
 0x1bc   : > { %979 = vmatprep.subr.bf16.mxu1 %v1320_v1 }
 0x1bf   : > { %980 = vmatpush3.bf16.msra.mxu1 %v1096_v32 }
 0x1c0   : > { %981 = vmatprep.subr.bf16.mxu1 %v1320_v1 }
 0x1c3   : > { %982 = vmatpush3.bf16.msra.mxu1 %v1097_v33 }
 0x1c4   : > { %983 = vmatprep.subr.bf16.mxu1 %v1320_v1 }
 0x1c7   : > { %984 = vmatpush3.bf16.msra.mxu1 %v1098_v34 }
 0x1c8   : > { %985 = vmatprep.subr.bf16.mxu1 %v1320_v1 }
 0x1cb   : > { %986 = vmatpush3.bf16.msra.mxu1 %v1099_v35 }
 0x281   : > { %v556_v37 = vpop.f32.mrb[0].mxu1 }
 0x282   : > { %v557_v38 = vadd.f32 %v904_v36, %v556_v37  ;;  %v969_v39 = vpop.f32.mrb[1].mxu1 }
 0x283   : > { %v559_v40 = vpop.f32.mrb[2].mxu1 }
 0x284   : > { %v560_v41 = vadd.f32 %v904_v36, %v559_v40  ;;  %v970_v42 = vpop.f32.mrb[3].mxu1  ;;  %v563_v43 = vmax.f32 %v557_v38, 0.0 }
 0x286   : > { %v564_v44 = vmax.f32 %v560_v41, 0.0 }
 0x288   : > { %v565_v45 = vadd.f32 %v564_v44, %v563_v43  ;;  %v573_v46 = vpack.c.bf16 %v564_v44, %v563_v43 }
 0x28a   : > { %988 = vmatmul.mubr.bf16.vlgmr.msra.gmra.mrb[4].mxu1 %v573_v46  ;;  %v566_v53 = vrot.slane %v565_v45, 4 }
 0x28c   : > { %v567_v58 = vadd.f32 %v566_v53, %v565_v45 }
 0x28e   : > { %v568_v63 = vrot.slane %v567_v58, 2 }
 0x290   : > { %v569_v2 = vadd.f32 %v568_v63, %v567_v58 }
 0x292   : > { %v570_v5 = vrot.slane %v569_v2, 1 }
 0x294   : > { %v571_v8 = vadd.f32 %v570_v5, %v569_v2 }
 0x35d   : > { %v672_v47 = vpop.f32.mrb[4].mxu1 }
 0x35e   : > { %v989_v48 = vpop.f32.mrb[5].mxu1 }
 0x35f   : > { %v675_v49 = vpop.f32.mrb[6].mxu1 }
 0x360   : > { %v679_v50 = vpack.c.bf16 %v675_v49, %v672_v47  ;;  %v990_v51 = vpop.f32.mrb[7].mxu1 }
 0x362   : > { %992 = vmatpush3.bf16.msra.mxu0 %v679_v50 }
 0x365   : > { %994 = vmatmul.mubr.msk.bf16.vlgmr.msra.gmra.mrb[4].mxu0 %vm518_vm1, %v905_v27 }
 0x438   : > { %v722_v54 = vpop.f32.mrb[4].mxu0 }
 0x439   : > { %v723_v55 = vadd.f32 %v916_v52, %v722_v54  ;;  %v995_v56 = vpop.f32.mrb[5].mxu0 }
 0x43a   : > { %v725_v57 = vpop.f32.mrb[6].mxu0 }
 0x43b   : > { %v726_v59 = vadd.f32 %v916_v52, %v725_v57  ;;  %v996_v60 = vpop.f32.mrb[7].mxu0  ;;  %v729_v61 = vmax.f32 %v723_v55, 0.0 }
 0x43d   : > { %v730_v62 = vmax.f32 %v726_v59, 0.0 }
 0x43f   : > { %v731_v0 = vadd.f32 %v730_v62, %v729_v61 }
 0x441   : > { %v732_v1 = vrot.slane %v731_v0, 4 }
 0x443   : > { %v733_v3 = vadd.f32 %v732_v1, %v731_v0 }
 0x445   : > { %v734_v4 = vrot.slane %v733_v3, 2 }
 0x447   : > { %v735_v6 = vadd.f32 %v734_v4, %v733_v3 }
 0x449   : > { %v736_v7 = vrot.slane %v735_v6, 1 }
 0x44b   : > { %v737_v9 = vadd.f32 %v736_v7, %v735_v6 }
 0x44d   : > { %v738_v10 = vadd.f32 %v737_v9, %v571_v8 }
 0x44f   : > { %v739_v11 = vmul.f32 0.03125, %v738_v10 }
 0x451   : > { %740 = vst [vmem:[%s349_s30] sm:$0x1] %v739_v11 }
 0x452   : > { %1242 = shalt.err (!%p1239_p11)
}
 0x453   : > { %s1243_s4 = scalar_lea.hbm %s1673_s16, 16  ;;  %s1247_s26 = scalar_lea.hbm %s1723_s6, 32 }
 0x454   : > { %p1244_p8 = scmp.ne.s32.totalorder %s1673_s16, %s1243_s4  ;;  %p1248_p13 = scmp.lt.u32.totalorder %s1673_s16, %s1723_s6 }
 0x455   : > { %p1249_p9 = scmp.lt.u32.totalorder %s1247_s26, %s1243_s4  ;;  %p1251_p4 = scmp.lt.u32.totalorder %s1243_s4, %s1673_s16 }
 0x456   : > { %p1245_p10 = pnand %p1244_p8, %p1754_p6 }
 0x457   : > { %p1250_p12 = por %p1249_p9, %p1248_p13 }
 0x458   : > { %p1246_p5 = pneg %p1245_p10 }
 0x459   : > { %p1252_p0 = por %p1251_p4, %p1250_p12 }
 0x45b   : > { %p1253_p1 = pnand %p1252_p0, %p1246_p5 }
 0x45d   : > { %1256 = shalt.err (!%p1253_p1)
}
 0x45e   : > { %1013 = dma.vmem_to_hbm [thread:$0]  (%p1754_p6), %s1675_s18, 16, %s1673_s16, %s742_s10  }
 0x45f PF: > { %s766_s27 = sand.u32 1, %s1299_s21   ;;  %p1755_p2 = scmp.ne.s32.totalorder %s1734_s28, 0 }
 0x460   : > { %p1756_p3 = scmp.ge.s32.totalorder %s1311_s24, 2  ;;  %s767_s20 = scalar_lea.sflag [#allocation4], %s766_s27 }
 0x462   : > { %p1033_p7 = pnand %p1756_p3, %p1755_p2 }
 0x464   : > { %1294 = dma.done.wait (!%p1033_p7), %s767_s20, 16  }
 0x465   : > { %1296 = vsyncadd (!%p1033_p7), %s767_s20, 4294967280  ;;  %p24_p11 = scmp.ge.s32.totalorder %s1490_s8, 4   ;;  %s1757_s21 = smov %s1303_s22 }
 0x466   : > { %s1758_s22 = smov %s1307_s23  ;;  %s1759_s23 = smov %s1500_s9 }
 0x467   : > { %s1760_s24 = smov %s1490_s8  ;;  %26 = sbr.rel (!%p24_p11) target bundleno = 14 (0xe), region = 117 }
 0x46e   :  { %771 = vsyncpa [#allocation3], 1 }
 0x46f   :  { %773 = vsyncpa [#allocation3 + $0x1], 1 }
 0x470   :  { %774 = vsyncpa [#allocation8], 1 }
 0x471   :  { %776 = vsyncpa [#allocation8 + $0x1], 1 }
 0x472   :  { %777 = vsyncpa [#allocation11], 1 }
 0x473   :  { %778 = vsyncpa [#allocation4], 1 }
 0x474   :  { %780 = vsyncpa [#allocation4 + $0x1], 1 }
 0x475   :  { %781 = vsyncpa [#allocation5], 1 }
 0x476   :  { %783 = vsyncpa [#allocation5 + $0x1], 1 }

</bundles_post_ra>
